<compile_context>
chip_gen: v7x
topology: tpu7x:2x2x1
jax: 0.10.0
libtpu: 0.0.40
codegen_flags: <defaults>
</compile_context>

<pallas_src>
import jax
import jax.numpy as jnp
from jax.experimental import pallas as pl
from jax.experimental.pallas import tpu as pltpu


def _round_up(x, m):
    return (x + m - 1) // m * m


def _make_kernel(*, hw_true, thw, ragged_hw, lane_partial):
    """Build the channelWise kernel for one static tiling.

    Refs:
      x_ref:   (TN, C, THW)      activation tile (f32)
      w1_ref:  (C, Dp)           fused fc1 weight  ( = w1.T * bn1_scale / HW )
      b1_ref:  (1, Dp)           fused fc1 bias    ( = b1*bn1_scale + bn1_shift )
      w2_ref:  (Dp, CoutP)       fused fc2 weight  ( = w2.T * bn2_scale )
      b2_ref:  (1, CoutP)        fused fc2 bias
      o_ref:   (TN, CoutP)
      sum_ref: (TN, C, 128) f32  per-lane partial sums   (lane_partial=True)
               (TN, C)      f32  running spatial sum     (lane_partial=False)
    """

    def kernel(x_ref, w1_ref, b1_ref, w2_ref, b2_ref, o_ref, sum_ref):
        hw_i = pl.program_id(1)

        @pl.when(hw_i == 0)
        def _init():
            sum_ref[...] = jnp.zeros_like(sum_ref)

        x = x_ref[...]
        if ragged_hw:
            # The HW grid over-covers the true spatial extent: out-of-bounds
            # lanes of the last tile contain garbage -> zero them.  On earlier
            # tiles the mask is all-true (cheap VPU compare + select).
            lane = jax.lax.broadcasted_iota(jnp.int32, x.shape, 2)
            x = jnp.where(lane < (hw_true - hw_i * thw), x, 0.0)

        if lane_partial:
            # Fold the spatial axis 128 lanes at a time with VPU adds; the
            # single cross-lane (XLU) reduce happens once, at finalization.
            acc = x[:, :, 0:128]
            for j in range(1, thw // 128):
                acc = acc + x[:, :, j * 128:(j + 1) * 128]
            sum_ref[...] += acc
        else:
            # Only reachable when the whole HW fits in a single (non-128-
            # aligned) tile, so this XLU reduce runs exactly once anyway.
            sum_ref[...] += jnp.sum(x, axis=-1)

        @pl.when(hw_i == pl.num_programs(1) - 1)
        def _finalize():
            if lane_partial:
                s = jnp.sum(sum_ref[...], axis=-1)   # single XLU reduce
            else:
                s = sum_ref[...]
            h = jnp.dot(s, w1_ref[...], preferred_element_type=jnp.float32)
            h = jnp.maximum(h + b1_ref[...], 0.0)
            o = jnp.dot(h, w2_ref[...], preferred_element_type=jnp.float32)
            o_ref[...] = jnp.maximum(o + b2_ref[...], 0.0).astype(o_ref.dtype)

    return kernel


def channel_wise_forward(x_nchw, params, *, x_tile_bytes_cap=12 << 20):
    """x_nchw: (N, C, H, W) float32. Returns (N, inplanes*M, 1, 1) float32."""
    N, C, H, W = x_nchw.shape
    HW = H * W
    w1, b1, s1, t1, w2, b2, s2, t2 = params
    d = w1.shape[0]
    cout = w2.shape[0]

    # ---- host-side folding: transpose + bias + BN + 1/HW into the weights ----
    w1f = (w1.T * s1[None, :]) / float(HW)            # (C, d)
    b1f = (b1 * s1 + t1)[None, :]                     # (1, d)
    w2f = w2.T * s2[None, :]                          # (d, cout)
    b2f = (b2 * s2 + t2)[None, :]                     # (1, cout)

    # Lane-dense padding of the (tiny) hidden / output-channel dims -> dense vst.
    d_pad = _round_up(d, 128)
    cout_pad = _round_up(cout, 128)
    w1f = jnp.pad(w1f, ((0, 0), (0, d_pad - d)))
    b1f = jnp.pad(b1f, ((0, 0), (0, d_pad - d)))
    w2f = jnp.pad(w2f, ((0, d_pad - d), (0, cout_pad - cout)))
    b2f = jnp.pad(b2f, ((0, 0), (0, cout_pad - cout)))

    # ---- tiling ----------------------------------------------------------------
    # TN: whole batch when N <= 8 (output block sublane dim == full dim is legal
    # for any N); otherwise 8 rows per step (multiple of 8).  We never go below
    # 8 for N > 8 because the output block's sublane dim would become illegal,
    # so instead the vmem limit below is always sized from the actual tile.
    tn = N if N <= 8 else 8
    n_blocks = pl.cdiv(N, tn)
    itemsize = x_nchw.dtype.itemsize

    # Fixed-resident VMEM (weights single-buffered, double-buffered output tile,
    # worst-case lane-partial scratch), then give the rest of a ~40 MiB working
    # set to the streamed x tile.  40 MiB + margin fits v7x's 64 MiB physical
    # VMEM and is far inside v5e/v6e's 128 MiB.
    w_bytes = (C * d_pad + d_pad + d_pad * cout_pad + cout_pad) * 4
    out_bytes = 2 * tn * cout_pad * 4
    scratch_worst = tn * max(C, 8) * 128 * 4
    budget_half = max(128 * 1024, ((40 << 20) - (w_bytes + out_bytes + scratch_worst)) // 2)
    x_buf_cap = min(int(x_tile_bytes_cap), budget_half)

    thw_cap = max(128, (x_buf_cap // (itemsize * tn * C)) // 128 * 128)
    thw = HW if HW <= thw_cap else thw_cap
    hw_blocks = pl.cdiv(HW, thw)
    ragged_hw = (HW % thw) != 0
    lane_partial = (thw % 128) == 0

    x = x_nchw.reshape(N, C, HW)   # free: NCHW is contiguous over (H, W)

    x_bytes = tn * C * thw * itemsize
    if lane_partial:
        scratch = pltpu.VMEM((tn, C, 128), jnp.float32)
        scratch_bytes = tn * C * 128 * 4
    else:
        scratch = pltpu.VMEM((tn, C), jnp.float32)
        scratch_bytes = tn * C * 4

    kernel = _make_kernel(hw_true=HW, thw=thw, ragged_hw=ragged_hw,
                          lane_partial=lane_partial)

    def run(single_buffer_weights):
        if single_buffer_weights:
            def const_spec(shape):
                return pl.BlockSpec(shape, lambda n, s: (0,) * len(shape),
                                    pipeline_mode=pl.Buffered(1))
            w_buf = 1
        else:
            def const_spec(shape):
                return pl.BlockSpec(shape, lambda n, s: (0,) * len(shape))
            w_buf = 2

        total = 2 * x_bytes + w_buf * w_bytes + out_bytes + scratch_bytes
        vmem_limit = min(max(total + (8 << 20), 32 << 20), 112 << 20)

        return pl.pallas_call(
            kernel,
            out_shape=jax.ShapeDtypeStruct((N, cout_pad), jnp.float32),
            grid_spec=pltpu.PrefetchScalarGridSpec(
                num_scalar_prefetch=0,
                grid=(n_blocks, hw_blocks),
                in_specs=[
                    pl.BlockSpec((tn, C, thw), lambda n, s: (n, 0, s)),  # x
                    const_spec((C, d_pad)),          # fused fc1 weight
                    const_spec((1, d_pad)),          # fused fc1 bias
                    const_spec((d_pad, cout_pad)),   # fused fc2 weight
                    const_spec((1, cout_pad)),       # fused fc2 bias
                ],
                out_specs=pl.BlockSpec((tn, cout_pad), lambda n, s: (n, 0)),
                scratch_shapes=[scratch],
            ),
            compiler_params=pltpu.CompilerParams(
                dimension_semantics=("parallel", "arbitrary"),
                vmem_limit_bytes=int(vmem_limit)),
        )(x, w1f, b1f, w2f, b2f)

    try:
        out = run(single_buffer_weights=True)
    except Exception:
        # pl.Buffered(1) unsupported on this jax version -> double-buffered
        # weights (slightly more VMEM, otherwise identical kernel).
        out = run(single_buffer_weights=False)

    return out[:, :cout].reshape(N, cout, 1, 1)


def make_params(key, inplanes, d, M, eps=1e-5):
    """Deterministic synthetic parameters (mirrors the PyTorch module shapes)."""
    ks = jax.random.split(key, 12)
    cout = inplanes * M

    # fc1[0]: Conv2d(inplanes, d, 1x1) -> weight (d, inplanes), bias (d,)
    w1 = jax.random.normal(ks[0], (d, inplanes), jnp.float32) * 0.01
    b1 = jax.random.normal(ks[1], (d,), jnp.float32) * 0.01
    # fc1[1]: BatchNorm2d(d) in eval mode -> fold into scale/shift
    g1 = 1.0 + 0.1 * jax.random.normal(ks[2], (d,), jnp.float32)
    be1 = 0.1 * jax.random.normal(ks[3], (d,), jnp.float32)
    rm1 = 0.1 * jax.random.normal(ks[4], (d,), jnp.float32)
    rv1 = jnp.abs(1.0 + 0.1 * jax.random.normal(ks[5], (d,), jnp.float32))
    s1 = g1 / jnp.sqrt(rv1 + eps)
    t1 = be1 - rm1 * s1

    # fc2[0]: Conv2d(d, inplanes*M, 1x1) -> weight (cout, d), bias (cout,)
    w2 = jax.random.normal(ks[6], (cout, d), jnp.float32) * 0.01
    b2 = jax.random.normal(ks[7], (cout,), jnp.float32) * 0.01
    # fc2[1]: BatchNorm2d(cout)
    g2 = 1.0 + 0.1 * jax.random.normal(ks[8], (cout,), jnp.float32)
    be2 = 0.1 * jax.random.normal(ks[9], (cout,), jnp.float32)
    rm2 = 0.1 * jax.random.normal(ks[10], (cout,), jnp.float32)
    rv2 = jnp.abs(1.0 + 0.1 * jax.random.normal(ks[11], (cout,), jnp.float32))
    s2 = g2 / jnp.sqrt(rv2 + eps)
    t2 = be2 - rm2 * s2

    return (w1, b1, s1, t1, w2, b2, s2, t2)


def reference_forward(x_nchw, params):
    """Pure-JAX reference of the same semantics (for sanity checking)."""
    w1, b1, s1, t1, w2, b2, s2, t2 = params
    gap = jnp.mean(x_nchw, axis=(2, 3))                       # (N, C)
    h = jnp.maximum((gap @ w1.T + b1) * s1 + t1, 0.0)
    o = jnp.maximum((h @ w2.T + b2) * s2 + t2, 0.0)
    return o[:, :, None, None]


if __name__ == "__main__":
    inplanes, d, M = 4, 8, 2
    key = jax.random.PRNGKey(0)
    kx1, kx2, kx3, kp = jax.random.split(key, 4)
    params = make_params(kp, inplanes, d, M)

    # 1) Primary small case (N=2, 16x16): single batch block, single HW tile.
    x1 = jax.random.normal(kx1, (2, inplanes, 16, 16), jnp.float32)
    out1 = jax.block_until_ready(channel_wise_forward(x1, params))
    ref1 = reference_forward(x1, params)
    assert out1.shape == (2, inplanes * M, 1, 1), out1.shape
    assert jnp.allclose(out1, ref1, atol=1e-5, rtol=1e-4), "mismatch (case 1)"

    # 2) Ragged spatial extent + multi-step HW accumulation (forced tiny tile
    #    exercises the in-kernel lane mask instead of a host-side pad).
    x2 = jax.random.normal(kx2, (3, inplanes, 17, 17), jnp.float32)
    out2 = jax.block_until_ready(
        channel_wise_forward(x2, params, x_tile_bytes_cap=4096))
    ref2 = reference_forward(x2, params)
    assert out2.shape == (3, inplanes * M, 1, 1), out2.shape
    assert jnp.allclose(out2, ref2, atol=1e-5, rtol=1e-4), "mismatch (case 2)"

    # 3) Batch remainder (N=10 with TN=8): last batch block over-covers; the
    #    out-of-bounds output rows are masked by Pallas, no host-side pad of x.
    x3 = jax.random.normal(kx3, (10, inplanes, 16, 16), jnp.float32)
    out3 = jax.block_until_ready(channel_wise_forward(x3, params))
    ref3 = reference_forward(x3, params)
    assert out3.shape == (10, inplanes * M, 1, 1), out3.shape
    assert jnp.allclose(out3, ref3, atol=1e-5, rtol=1e-4), "mismatch (case 3)"

    print("KERNEL_OK")
</pallas_src>

<mosaic_0001>
module attributes {stable_mosaic.version = 11 : i64} {
  func.func @kernel(%arg0: i32, %arg1: i32, %arg2: memref<2x4x256xf32, #tpu.memory_space<vmem>>, %arg3: memref<4x128xf32, #tpu.memory_space<vmem>>, %arg4: memref<1x128xf32, #tpu.memory_space<vmem>>, %arg5: memref<128x128xf32, #tpu.memory_space<vmem>>, %arg6: memref<1x128xf32, #tpu.memory_space<vmem>>, %arg7: memref<2x128xf32, #tpu.memory_space<vmem>>, %arg8: memref<2x4x128xf32, #tpu.memory_space<vmem>>) attributes {dimension_semantics = [#tpu.dimension_semantics<parallel>, #tpu.dimension_semantics<arbitrary>], iteration_bounds = array<i64: 1, 1>, scalar_prefetch = 0 : i64, scratch_operands = 1 : i64, tpu.core_type = #tpu.core_type<tc>, window_params = [{transform_indices = @transform_0, window_bounds = array<i64: 2, 4, 256>}, {pipeline_mode = #tpu.pipeline_mode<synchronous>, transform_indices = @transform_1, window_bounds = array<i64: 4, 128>}, {pipeline_mode = #tpu.pipeline_mode<synchronous>, transform_indices = @transform_2, window_bounds = array<i64: 1, 128>}, {pipeline_mode = #tpu.pipeline_mode<synchronous>, transform_indices = @transform_3, window_bounds = array<i64: 128, 128>}, {pipeline_mode = #tpu.pipeline_mode<synchronous>, transform_indices = @transform_4, window_bounds = array<i64: 1, 128>}, {transform_indices = @transform_5, window_bounds = array<i64: 2, 128>}]} {
    %c0_i32 = arith.constant 0 : i32
    %0 = arith.cmpi eq, %arg1, %c0_i32 : i32
    %1 = arith.extui %0 : i1 to i32
    %c0_i32_0 = arith.constant 0 : i32
    %2 = arith.cmpi ne, %1, %c0_i32_0 : i32
    scf.if %2 {
      %cst = arith.constant 0.000000e+00 : f32
      %13 = vector.broadcast %cst : f32 to vector<2x4x128xf32>
      %c0_11 = arith.constant 0 : index
      %c0_12 = arith.constant 0 : index
      %c0_13 = arith.constant 0 : index
      %14 = vector.load %arg8[%c0_11, %c0_12, %c0_13] : memref<2x4x128xf32, #tpu.memory_space<vmem>>, vector<2x4x128xf32>
      tpu.vector_store %arg8[%c0_11, %c0_12, %c0_13], %13 {strides = array<i32>} : memref<2x4x128xf32, #tpu.memory_space<vmem>>, vector<2x4x128xf32>,
    } else {
    }
    %c0 = arith.constant 0 : index
    %c0_1 = arith.constant 0 : index
    %c0_2 = arith.constant 0 : index
    %3 = vector.load %arg2[%c0, %c0_1, %c0_2] : memref<2x4x256xf32, #tpu.memory_space<vmem>>, vector<2x4x256xf32>
    %4 = vector.extract_strided_slice %3 {offsets = [0, 0, 0], sizes = [2, 4, 128], strides = [1, 1, 1]} : vector<2x4x256xf32> to vector<2x4x128xf32>
    %5 = vector.extract_strided_slice %3 {offsets = [0, 0, 128], sizes = [2, 4, 128], strides = [1, 1, 1]} : vector<2x4x256xf32> to vector<2x4x128xf32>
    %6 = arith.addf %4, %5 : vector<2x4x128xf32>
    %c0_3 = arith.constant 0 : index
    %c0_4 = arith.constant 0 : index
    %c0_5 = arith.constant 0 : index
    %7 = vector.load %arg8[%c0_3, %c0_4, %c0_5] : memref<2x4x128xf32, #tpu.memory_space<vmem>>, vector<2x4x128xf32>
    %8 = arith.addf %7, %6 : vector<2x4x128xf32>
    %c0_6 = arith.constant 0 : index
    %c0_7 = arith.constant 0 : index
    %c0_8 = arith.constant 0 : index
    %9 = vector.load %arg8[%c0_6, %c0_7, %c0_8] : memref<2x4x128xf32, #tpu.memory_space<vmem>>, vector<2x4x128xf32>
    tpu.vector_store %arg8[%c0_6, %c0_7, %c0_8], %8 {strides = array<i32>} : memref<2x4x128xf32, #tpu.memory_space<vmem>>, vector<2x4x128xf32>,
    %c0_i32_9 = arith.constant 0 : i32
    %10 = arith.cmpi eq, %arg1, %c0_i32_9 : i32
    %11 = arith.extui %10 : i1 to i32
    %c0_i32_10 = arith.constant 0 : i32
    %12 = arith.cmpi ne, %11, %c0_i32_10 : i32
    scf.if %12 {
      %c0_11 = arith.constant 0 : index
      %c0_12 = arith.constant 0 : index
      %c0_13 = arith.constant 0 : index
      %13 = vector.load %arg8[%c0_11, %c0_12, %c0_13] : memref<2x4x128xf32, #tpu.memory_space<vmem>>, vector<2x4x128xf32>
      %cst = arith.constant dense<0.000000e+00> : vector<2x4xf32>
      %14 = vector.multi_reduction <add>, %13, %cst [2] : vector<2x4x128xf32> to vector<2x4xf32>
      %c0_14 = arith.constant 0 : index
      %c0_15 = arith.constant 0 : index
      %15 = vector.load %arg3[%c0_14, %c0_15] : memref<4x128xf32, #tpu.memory_space<vmem>>, vector<4x128xf32>
      %cst_16 = arith.constant dense<0.000000e+00> : vector<2x128xf32>
      %16 = tpu.matmul %14, %15, %cst_16 {dimension_numbers = #tpu.dot_dimension_numbers<[1], [0], [0], [1], [0, 0, 1, 1], [], []>} : vector<2x4xf32>, vector<4x128xf32>, vector<2x128xf32> -> vector<2x128xf32>
      %c0_17 = arith.constant 0 : index
      %c0_18 = arith.constant 0 : index
      %17 = vector.load %arg4[%c0_17, %c0_18] : memref<1x128xf32, #tpu.memory_space<vmem>>, vector<1x128xf32>
      %18 = vector.broadcast %17 : vector<1x128xf32> to vector<2x128xf32>
      %19 = arith.addf %16, %18 : vector<2x128xf32>
      %cst_19 = arith.constant 0.000000e+00 : f32
      %20 = vector.broadcast %cst_19 : f32 to vector<2x128xf32>
      %21 = arith.maximumf %19, %20 : vector<2x128xf32>
      %c0_20 = arith.constant 0 : index
      %c0_21 = arith.constant 0 : index
      %22 = vector.load %arg5[%c0_20, %c0_21] : memref<128x128xf32, #tpu.memory_space<vmem>>, vector<128x128xf32>
      %cst_22 = arith.constant dense<0.000000e+00> : vector<2x128xf32>
      %23 = tpu.matmul %21, %22, %cst_22 {dimension_numbers = #tpu.dot_dimension_numbers<[1], [0], [0], [1], [0, 0, 1, 1], [], []>} : vector<2x128xf32>, vector<128x128xf32>, vector<2x128xf32> -> vector<2x128xf32>
      %c0_23 = arith.constant 0 : index
      %c0_24 = arith.constant 0 : index
      %24 = vector.load %arg6[%c0_23, %c0_24] : memref<1x128xf32, #tpu.memory_space<vmem>>, vector<1x128xf32>
      %25 = vector.broadcast %24 : vector<1x128xf32> to vector<2x128xf32>
      %26 = arith.addf %23, %25 : vector<2x128xf32>
      %cst_25 = arith.constant 0.000000e+00 : f32
      %27 = vector.broadcast %cst_25 : f32 to vector<2x128xf32>
      %28 = arith.maximumf %26, %27 : vector<2x128xf32>
      %c0_26 = arith.constant 0 : index
      %c0_27 = arith.constant 0 : index
      %29 = vector.load %arg7[%c0_26, %c0_27] : memref<2x128xf32, #tpu.memory_space<vmem>>, vector<2x128xf32>
      tpu.vector_store %arg7[%c0_26, %c0_27], %28 {strides = array<i32>} : memref<2x128xf32, #tpu.memory_space<vmem>>, vector<2x128xf32>,
    } else {
    }
    return
  }
  func.func @transform_0(%arg0: i32, %arg1: i32) -> (i32, i32, i32) {
    %c0_i32 = arith.constant 0 : i32
    %c0_i32_0 = arith.constant 0 : i32
    return %arg0, %c0_i32, %arg1 : i32, i32, i32
  }
  func.func @transform_1(%arg0: i32, %arg1: i32) -> (i32, i32) {
    %c0_i32 = arith.constant 0 : i32
    %c0_i32_0 = arith.constant 0 : i32
    %c0_i32_1 = arith.constant 0 : i32
    return %c0_i32, %c0_i32_0 : i32, i32
  }
  func.func @transform_2(%arg0: i32, %arg1: i32) -> (i32, i32) {
    %c0_i32 = arith.constant 0 : i32
    %c0_i32_0 = arith.constant 0 : i32
    %c0_i32_1 = arith.constant 0 : i32
    return %c0_i32, %c0_i32_0 : i32, i32
  }
  func.func @transform_3(%arg0: i32, %arg1: i32) -> (i32, i32) {
    %c0_i32 = arith.constant 0 : i32
    %c0_i32_0 = arith.constant 0 : i32
    %c0_i32_1 = arith.constant 0 : i32
    return %c0_i32, %c0_i32_0 : i32, i32
  }
  func.func @transform_4(%arg0: i32, %arg1: i32) -> (i32, i32) {
    %c0_i32 = arith.constant 0 : i32
    %c0_i32_0 = arith.constant 0 : i32
    %c0_i32_1 = arith.constant 0 : i32
    return %c0_i32, %c0_i32_0 : i32, i32
  }
  func.func @transform_5(%arg0: i32, %arg1: i32) -> (i32, i32) {
    %c0_i32 = arith.constant 0 : i32
    %c0_i32_0 = arith.constant 0 : i32
    return %arg0, %c0_i32 : i32, i32
  }
}

module attributes {stable_mosaic.version = 11 : i64} {
  func.func @kernel(%arg0: i32, %arg1: i32, %arg2: memref<2x4x256xf32, #tpu.memory_space<vmem>>, %arg3: memref<4x128xf32, #tpu.memory_space<vmem>>, %arg4: memref<1x128xf32, #tpu.memory_space<vmem>>, %arg5: memref<128x128xf32, #tpu.memory_space<vmem>>, %arg6: memref<1x128xf32, #tpu.memory_space<vmem>>, %arg7: memref<2x128xf32, #tpu.memory_space<vmem>>, %arg8: memref<2x4x128xf32, #tpu.memory_space<vmem>>) attributes {dimension_semantics = [#tpu.dimension_semantics<parallel>, #tpu.dimension_semantics<arbitrary>], iteration_bounds = array<i64: 1, 1>, scalar_prefetch = 0 : i64, scratch_operands = 1 : i64, tpu.core_type = #tpu.core_type<tc>, window_params = [{transform_indices = @transform_0, window_bounds = array<i64: 2, 4, 256>}, {pipeline_mode = #tpu.pipeline_mode<synchronous>, transform_indices = @transform_1, window_bounds = array<i64: 4, 128>}, {pipeline_mode = #tpu.pipeline_mode<synchronous>, transform_indices = @transform_2, window_bounds = array<i64: 1, 128>}, {pipeline_mode = #tpu.pipeline_mode<synchronous>, transform_indices = @transform_3, window_bounds = array<i64: 128, 128>}, {pipeline_mode = #tpu.pipeline_mode<synchronous>, transform_indices = @transform_4, window_bounds = array<i64: 1, 128>}, {transform_indices = @transform_5, window_bounds = array<i64: 2, 128>}]} {
    %c0_i32 = arith.constant 0 : i32
    %0 = arith.cmpi eq, %arg1, %c0_i32 : i32
    %1 = arith.extui %0 : i1 to i32
    %c0_i32_0 = arith.constant 0 : i32
    %2 = arith.cmpi ne, %1, %c0_i32_0 : i32
    scf.if %2 {
      %cst = arith.constant 0.000000e+00 : f32
      %13 = vector.broadcast %cst : f32 to vector<2x4x128xf32>
      %c0_11 = arith.constant 0 : index
      %c0_12 = arith.constant 0 : index
      %c0_13 = arith.constant 0 : index
      %14 = vector.load %arg8[%c0_11, %c0_12, %c0_13] : memref<2x4x128xf32, #tpu.memory_space<vmem>>, vector<2x4x128xf32>
      tpu.vector_store %arg8[%c0_11, %c0_12, %c0_13], %13 {strides = array<i32>} : memref<2x4x128xf32, #tpu.memory_space<vmem>>, vector<2x4x128xf32>,
    } else {
    }
    %c0 = arith.constant 0 : index
    %c0_1 = arith.constant 0 : index
    %c0_2 = arith.constant 0 : index
    %3 = vector.load %arg2[%c0, %c0_1, %c0_2] : memref<2x4x256xf32, #tpu.memory_space<vmem>>, vector<2x4x256xf32>
    %4 = vector.extract_strided_slice %3 {offsets = [0, 0, 0], sizes = [2, 4, 128], strides = [1, 1, 1]} : vector<2x4x256xf32> to vector<2x4x128xf32>
    %5 = vector.extract_strided_slice %3 {offsets = [0, 0, 128], sizes = [2, 4, 128], strides = [1, 1, 1]} : vector<2x4x256xf32> to vector<2x4x128xf32>
    %6 = arith.addf %4, %5 : vector<2x4x128xf32>
    %c0_3 = arith.constant 0 : index
    %c0_4 = arith.constant 0 : index
    %c0_5 = arith.constant 0 : index
    %7 = vector.load %arg8[%c0_3, %c0_4, %c0_5] : memref<2x4x128xf32, #tpu.memory_space<vmem>>, vector<2x4x128xf32>
    %8 = arith.addf %7, %6 : vector<2x4x128xf32>
    %c0_6 = arith.constant 0 : index
    %c0_7 = arith.constant 0 : index
    %c0_8 = arith.constant 0 : index
    %9 = vector.load %arg8[%c0_6, %c0_7, %c0_8] : memref<2x4x128xf32, #tpu.memory_space<vmem>>, vector<2x4x128xf32>
    tpu.vector_store %arg8[%c0_6, %c0_7, %c0_8], %8 {strides = array<i32>} : memref<2x4x128xf32, #tpu.memory_space<vmem>>, vector<2x4x128xf32>,
    %c0_i32_9 = arith.constant 0 : i32
    %10 = arith.cmpi eq, %arg1, %c0_i32_9 : i32
    %11 = arith.extui %10 : i1 to i32
    %c0_i32_10 = arith.constant 0 : i32
    %12 = arith.cmpi ne, %11, %c0_i32_10 : i32
    scf.if %12 {
      %c0_11 = arith.constant 0 : index
      %c0_12 = arith.constant 0 : index
      %c0_13 = arith.constant 0 : index
      %13 = vector.load %arg8[%c0_11, %c0_12, %c0_13] : memref<2x4x128xf32, #tpu.memory_space<vmem>>, vector<2x4x128xf32>
      %cst = arith.constant dense<0.000000e+00> : vector<2x4xf32>
      %14 = vector.multi_reduction <add>, %13, %cst [2] : vector<2x4x128xf32> to vector<2x4xf32>
      %c0_14 = arith.constant 0 : index
      %c0_15 = arith.constant 0 : index
      %15 = vector.load %arg3[%c0_14, %c0_15] : memref<4x128xf32, #tpu.memory_space<vmem>>, vector<4x128xf32>
      %cst_16 = arith.constant dense<0.000000e+00> : vector<2x128xf32>
      %16 = tpu.matmul %14, %15, %cst_16 {dimension_numbers = #tpu.dot_dimension_numbers<[1], [0], [0], [1], [0, 0, 1, 1], [], []>} : vector<2x4xf32>, vector<4x128xf32>, vector<2x128xf32> -> vector<2x128xf32>
      %c0_17 = arith.constant 0 : index
      %c0_18 = arith.constant 0 : index
      %17 = vector.load %arg4[%c0_17, %c0_18] : memref<1x128xf32, #tpu.memory_space<vmem>>, vector<1x128xf32>
      %18 = vector.broadcast %17 : vector<1x128xf32> to vector<2x128xf32>
      %19 = arith.addf %16, %18 : vector<2x128xf32>
      %cst_19 = arith.constant 0.000000e+00 : f32
      %20 = vector.broadcast %cst_19 : f32 to vector<2x128xf32>
      %21 = arith.maximumf %19, %20 : vector<2x128xf32>
      %c0_20 = arith.constant 0 : index
      %c0_21 = arith.constant 0 : index
      %22 = vector.load %arg5[%c0_20, %c0_21] : memref<128x128xf32, #tpu.memory_space<vmem>>, vector<128x128xf32>
      %cst_22 = arith.constant dense<0.000000e+00> : vector<2x128xf32>
      %23 = tpu.matmul %21, %22, %cst_22 {dimension_numbers = #tpu.dot_dimension_numbers<[1], [0], [0], [1], [0, 0, 1, 1], [], []>} : vector<2x128xf32>, vector<128x128xf32>, vector<2x128xf32> -> vector<2x128xf32>
      %c0_23 = arith.constant 0 : index
      %c0_24 = arith.constant 0 : index
      %24 = vector.load %arg6[%c0_23, %c0_24] : memref<1x128xf32, #tpu.memory_space<vmem>>, vector<1x128xf32>
      %25 = vector.broadcast %24 : vector<1x128xf32> to vector<2x128xf32>
      %26 = arith.addf %23, %25 : vector<2x128xf32>
      %cst_25 = arith.constant 0.000000e+00 : f32
      %27 = vector.broadcast %cst_25 : f32 to vector<2x128xf32>
      %28 = arith.maximumf %26, %27 : vector<2x128xf32>
      %c0_26 = arith.constant 0 : index
      %c0_27 = arith.constant 0 : index
      %29 = vector.load %arg7[%c0_26, %c0_27] : memref<2x128xf32, #tpu.memory_space<vmem>>, vector<2x128xf32>
      tpu.vector_store %arg7[%c0_26, %c0_27], %28 {strides = array<i32>} : memref<2x128xf32, #tpu.memory_space<vmem>>, vector<2x128xf32>,
    } else {
    }
    return
  }
  func.func @transform_0(%arg0: i32, %arg1: i32) -> (i32, i32, i32) {
    %c0_i32 = arith.constant 0 : i32
    %c0_i32_0 = arith.constant 0 : i32
    return %arg0, %c0_i32, %arg1 : i32, i32, i32
  }
  func.func @transform_1(%arg0: i32, %arg1: i32) -> (i32, i32) {
    %c0_i32 = arith.constant 0 : i32
    %c0_i32_0 = arith.constant 0 : i32
    %c0_i32_1 = arith.constant 0 : i32
    return %c0_i32, %c0_i32_0 : i32, i32
  }
  func.func @transform_2(%arg0: i32, %arg1: i32) -> (i32, i32) {
    %c0_i32 = arith.constant 0 : i32
    %c0_i32_0 = arith.constant 0 : i32
    %c0_i32_1 = arith.constant 0 : i32
    return %c0_i32, %c0_i32_0 : i32, i32
  }
  func.func @transform_3(%arg0: i32, %arg1: i32) -> (i32, i32) {
    %c0_i32 = arith.constant 0 : i32
    %c0_i32_0 = arith.constant 0 : i32
    %c0_i32_1 = arith.constant 0 : i32
    return %c0_i32, %c0_i32_0 : i32, i32
  }
  func.func @transform_4(%arg0: i32, %arg1: i32) -> (i32, i32) {
    %c0_i32 = arith.constant 0 : i32
    %c0_i32_0 = arith.constant 0 : i32
    %c0_i32_1 = arith.constant 0 : i32
    return %c0_i32, %c0_i32_0 : i32, i32
  }
  func.func @transform_5(%arg0: i32, %arg1: i32) -> (i32, i32) {
    %c0_i32 = arith.constant 0 : i32
    %c0_i32_0 = arith.constant 0 : i32
    return %arg0, %c0_i32 : i32, i32
  }
}

</mosaic_0001>

<bundles_post_ra>
// kernel: tpu_custom_call.1
= control target key start
LH: loop header
LB: loop body
LE: loop exit
PB: predicated region body
PF: predicated region fallthrough
CT: control target
= control target key end

     0   :  { %10 = vsyncpa [#allocation4], 0  ;;  %s594_s0 = inlined_call_operand.hbm [shape: f32[2,4,256], index: 0, kind: input, shape index: {}]   ;;  %s595_s1 = inlined_call_operand.hbm [shape: f32[4,128], index: 1, kind: input, shape index: {}]   ;;  %s596_s2 = inlined_call_operand.vmem [shape: f32[1,128], index: 2, kind: input, shape index: {}]   ;;  %s597_s3 = inlined_call_operand.hbm [shape: f32[128,128], index: 3, kind: input, shape index: {}]   ;;  %s598_s4 = inlined_call_operand.vmem [shape: f32[1,128], index: 4, kind: input, shape index: {}]   ;;  %s599_s5 = inlined_call_operand.hbm [shape: f32[2,128], index: 5, kind: output, shape index: {}]  }
   0x1   :  { %11 = vsyncpa [#allocation7], 0 }
   0x2   :  { %12 = vsyncpa [#allocation5], 0  ;;  %s494_s18 = smov [#allocation6]   ;;  %s495_s20 = smov [#allocation3]  }
   0x3   :  { %s31_s19 = sshll.u32 %s494_s18, 4  ;;  %s18_s21 = sshll.u32 %s495_s20, 4  ;;  %s32_s19 = int_to_ptr.vmem [resolvable:$true] %s31_s19  ;;  %s533_s21 = int_to_ptr.vmem [resolvable:$true] %s18_s21 }
   0x4   :  { %s400_s24 = scalar_lea.hbm %s595_s1, 64 }
   0x5   :  { %p401_p0 = scmp.ne.s32.totalorder %s595_s1, %s400_s24  ;;  %p404_p1 = scmp.lt.u32.totalorder %s400_s24, %s595_s1 }
   0x7   :  { %p406_p2 = pnand %p404_p1, %p401_p0 }
   0x9   :  { %409 = shalt.err (!%p406_p2)
}
   0xa   :  { %s410_s29 = scalar_lea.vmem %s32_s19, 64  ;;  %p415_p4 = scmp.lt.s32.totalorder %s32_s19, %s32_s19 }
   0xb   :  { %p411_p3 = scmp.ne.s32.totalorder %s32_s19, %s410_s29  ;;  %p416_p5 = scmp.lt.s32.totalorder %s410_s29, %s410_s29 }
   0xd   :  { %p417_p6 = por %p416_p5, %p415_p4 }
   0xf   :  { %p418_p7 = pnand %p417_p6, %p411_p3 }
  0x11   :  { %421 = shalt.err (!%p418_p7)
}
  0x12   :  { %34 = dma.hbm_to_vmem [thread:$0]  %s595_s1, 64, %s32_s19, [#allocation7]  }
  0x13   :  { %s422_s9 = scalar_lea.hbm %s594_s0, 256 }
  0x14   :  { %p423_p8 = scmp.ne.s32.totalorder %s594_s0, %s422_s9  ;;  %p426_p9 = scmp.lt.u32.totalorder %s422_s9, %s594_s0 }
  0x16   :  { %p428_p10 = pnand %p426_p9, %p423_p8 }
  0x18   :  { %431 = shalt.err (!%p428_p10)
}
  0x19   :  { %s432_s14 = scalar_lea.vmem %s533_s21, 256  ;;  %p437_p12 = scmp.lt.s32.totalorder %s533_s21, %s533_s21 }
  0x1a   :  { %p433_p11 = scmp.ne.s32.totalorder %s533_s21, %s432_s14  ;;  %p438_p13 = scmp.lt.s32.totalorder %s432_s14, %s432_s14 }
  0x1c   :  { %p439_p0 = por %p438_p13, %p437_p12 }
  0x1e   :  { %p440_p1 = pnand %p439_p0, %p433_p11 }
  0x20   :  { %443 = shalt.err (!%p440_p1)
}
  0x21   :  { %s496_s1 = smov 128   ;;  %s497_s15 = smov 8  }
  0x22   :  { %24 = dma.hbm_to_vmem [thread:$0]  %s594_s0, 256, %s533_s21, [#allocation4], %s496_s1, %s496_s1, %s497_s15  }
  0x23   :  { %s498_s18 = smov [#allocation8]   ;;  %s444_s23 = scalar_lea.hbm %s597_s3, 2048 }
  0x24   :  { %s42_s19 = sshll.u32 %s498_s18, 4  ;;  %p445_p2 = scmp.ne.s32.totalorder %s597_s3, %s444_s23  ;;  %s43_s19 = int_to_ptr.vmem [resolvable:$true] %s42_s19 }
  0x25   :  { %p448_p3 = scmp.lt.u32.totalorder %s444_s23, %s597_s3 }
  0x27   :  { %p450_p4 = pnand %p448_p3, %p445_p2 }
  0x29   :  { %453 = shalt.err (!%p450_p4)
}
  0x2a   :  { %s454_s28 = scalar_lea.vmem %s43_s19, 2048  ;;  %p459_p6 = scmp.lt.s32.totalorder %s43_s19, %s43_s19 }
  0x2b   :  { %p455_p5 = scmp.ne.s32.totalorder %s43_s19, %s454_s28  ;;  %p460_p7 = scmp.lt.s32.totalorder %s454_s28, %s454_s28 }
  0x2d   :  { %p461_p8 = por %p460_p7, %p459_p6 }
  0x2f   :  { %p462_p9 = pnand %p461_p8, %p455_p5 }
  0x31   :  { %465 = shalt.err (!%p462_p9)
}
  0x32   :  { %48 = dma.hbm_to_vmem [thread:$0]  %s597_s3, 2048, %s43_s19, [#allocation7], %s496_s1, %s496_s1, %s497_s15  }
  0x33   :  { %488 = dma.done.wait [#allocation4], 256  }
  0x34   :  { %489 = vsyncadd [#allocation4], 4294967040 }
  0x35   :  { %490 = dma.done.wait [#allocation7], 2112  }
  0x36   :  { %491 = vsyncadd [#allocation7], 4294965184  ;;  %v499_v0 = vmov 0.0   ;;  %v66_v1 = vld [vmem:[#allocation3] sm:$0xff]  ;;  %v67_v2 = vld [vmem:[#allocation3 + $0x8] sm:$0xff]  ;;  %vm87_vm0 = vcmask 1043456   ;;  %v104_v38 = vlaneseq }
  0x37   :  { %64 = vst [vmem:[#allocation2] sm:$0xf] %v499_v0  ;;  %65 = vst [vmem:[#allocation2 + $0x4] sm:$0xf] %v499_v0  ;;  %327 = vmatprep.subr.mxu0 %v499_v0  ;;  %v70_v3 = vrot.slane %v66_v1, 4  ;;  %v71_v4 = vrot.slane %v67_v2, 4 }
  0x38   :  { %v94_v15 = vld [vmem:[#allocation6] sm:$0xf]  ;;  %vm500_vm1 = vmmov 0   ;;  %v193_v16 = vld [vmem:[#allocation8] sm:$0xff]  ;;  %v194_v17 = vld [vmem:[#allocation8 + $0x8] sm:$0xff]  ;;  %v501_v19 = vmov 0.0|0.0  }
  0x39   :  { %v74_v7 = vadd.f32 %v70_v3, %v66_v1  ;;  %v75_v8 = vadd.f32 %v71_v4, %v67_v2  ;;  %328 = vmatpush3.msk.msra.mxu0 %vm87_vm0, %v94_v15  ;;  %329 = vmatprep.mubr.msk.f32.mxu0 %vm500_vm1, %v499_v0  ;;  %v195_v18 = vld [vmem:[#allocation8 + $0x10] sm:$0xff]  ;;  %v368_v20 = vpack.c.bf16 %v194_v17, %v193_v16  ;;  %v196_v21 = vld [vmem:[#allocation8 + $0x18] sm:$0xff]  ;;  %v197_v23 = vld [vmem:[#allocation8 + $0x20] sm:$0xff]  ;;  %v105_v39 = vand.u32 127, %v104_v38  ;;  %s502_s7 = smov [#allocation9]  }
  0x3a   :  { %364 = vmatprep.mubr.msk.f32.mxu1 %vm500_vm1, %v499_v0  ;;  %367 = vmatprep.subr.bf16.mxu1 %v501_v19  ;;  %v371_v22 = vpack.c.bf16 %v196_v21, %v195_v18  ;;  %v198_v24 = vld [vmem:[#allocation8 + $0x28] sm:$0xff]  ;;  %v199_v26 = vld [vmem:[#allocation8 + $0x30] sm:$0xff]  ;;  %v200_v27 = vld [vmem:[#allocation8 + $0x38] sm:$0xff]  ;;  %v107_v40 = vshrl.u32 %v104_v38, 7  ;;  %vm114_vm2 = vcmask 1041409   ;;  %vm116_vm3 = vcmask 31744  }
  0x3b   :  { %369 = vmatpush3.bf16.msra.mxu1 %v368_v20  ;;  %v374_v25 = vpack.c.bf16 %v198_v24, %v197_v23  ;;  %v377_v28 = vpack.c.bf16 %v200_v27, %v199_v26  ;;  %v201_v29 = vld [vmem:[#allocation8 + $0x40] sm:$0xff]  ;;  %v202_v30 = vld [vmem:[#allocation8 + $0x48] sm:$0xff]  ;;  %v203_v32 = vld [vmem:[#allocation8 + $0x50] sm:$0xff]  ;;  %s294_s8 = sshll.u32 %s502_s7, 4  ;;  %s295_s8 = int_to_ptr.vmem [resolvable:$true] %s294_s8 }
  0x3c   :  { %370 = vmatprep.subr.bf16.mxu1 %v501_v19  ;;  %v380_v31 = vpack.c.bf16 %v202_v30, %v201_v29  ;;  %v204_v33 = vld [vmem:[#allocation8 + $0x58] sm:$0xff]  ;;  %v205_v35 = vld [vmem:[#allocation8 + $0x60] sm:$0xff]  ;;  %v206_v36 = vld [vmem:[#allocation8 + $0x68] sm:$0xff]  ;;  %v108_v42 = vsub.s32 %v105_v39, %v107_v40  ;;  %s466_s9 = scalar_lea.vmem %s295_s8, 32  ;;  %p471_p11 = scmp.lt.s32.totalorder %s295_s8, %s295_s8 }
  0x3d   :  { %v383_v34 = vpack.c.bf16 %v204_v33, %v203_v32  ;;  %v386_v37 = vpack.c.bf16 %v206_v36, %v205_v35  ;;  %v207_v47 = vld [vmem:[#allocation8 + $0x70] sm:$0xff]  ;;  %v208_v48 = vld [vmem:[#allocation8 + $0x78] sm:$0xff]  ;;  %v304_v50 = vld [vmem:[%s596_s2] ss:$0 sm:$0xff]  ;;  %p467_p10 = scmp.ne.s32.totalorder %s295_s8, %s466_s9  ;;  %p472_p12 = scmp.lt.s32.totalorder %s466_s9, %s466_s9 }
  0x3e   :  { %v76_v5 = vld [vmem:[#allocation2] sm:$0xf]  ;;  %v77_v6 = vld [vmem:[#allocation2 + $0x4] sm:$0xf]  ;;  %v389_v49 = vpack.c.bf16 %v208_v48, %v207_v47 }
  0x3f   :  { %v78_v9 = vadd.f32 %v76_v5, %v74_v7  ;;  %v79_v10 = vadd.f32 %v77_v6, %v75_v8  ;;  %372 = vmatpush3.bf16.msra.mxu1 %v371_v22  ;;  %v307_v55 = vld [vmem:[%s598_s4] ss:$0 sm:$0xff]  ;;  %p473_p13 = por %p472_p12, %p471_p11 }
  0x40   :  { %373 = vmatprep.subr.bf16.mxu1 %v501_v19 }
  0x41   :  { %80 = vst [vmem:[#allocation2] sm:$0xf] %v78_v9  ;;  %81 = vst [vmem:[#allocation2 + $0x4] sm:$0xf] %v79_v10  ;;  %p474_p0 = pnand %p473_p13, %p467_p10 }
  0x43   :  { %375 = vmatpush3.bf16.msra.mxu1 %v374_v25 }
  0x44   :  { %376 = vmatprep.subr.bf16.mxu1 %v501_v19 }
  0x47   :  { %378 = vmatpush3.bf16.msra.mxu1 %v377_v28 }
  0x48   :  { %v85_v11 = vld [vmem:[#allocation2] sm:$0xf]  ;;  %v86_v12 = vld [vmem:[#allocation2 + $0x4] sm:$0xf]  ;;  %379 = vmatprep.subr.bf16.mxu1 %v501_v19 }
  0x49   :  { %v88_v13 = vsel %vm87_vm0, %v85_v11, 0.0  ;;  %v91_v14 = vsel %vm87_vm0, %v86_v12, 0.0 }
  0x4a   :  { %89 = vadd.xlane.f32.xlu0 %v88_v13 }
  0x4b   :  { %381 = vmatpush3.bf16.msra.mxu1 %v380_v31 }
  0x4c   :  { %382 = vmatprep.subr.bf16.mxu1 %v501_v19 }
  0x4e   :  { %92 = vadd.xlane.f32.xlu0 %v91_v14 }
  0x4f   :  { %384 = vmatpush3.bf16.msra.mxu1 %v383_v34 }
  0x50   :  { %385 = vmatprep.subr.bf16.mxu1 %v501_v19 }
  0x53   :  { %387 = vmatpush3.bf16.msra.mxu1 %v386_v37 }
  0x54   :  { %388 = vmatprep.subr.bf16.mxu1 %v501_v19 }
  0x57   :  { %390 = vmatpush3.bf16.msra.mxu1 %v389_v49 }
  0xd7   :  { %v90_v41 = vpop.xlane.xlu0 %89 }
  0xd8   :  { %v109_v44 = vrot.slane %v90_v41, %v108_v42 }
  0xdb   :  { %v93_v43 = vpop.xlane.xlu0 %92 }
  0xdc   :  { %v113_v45 = vrot.slane %v93_v43, %v108_v42 }
  0xde   :  { %v115_v46 = vsel %vm114_vm2, %v113_v45, %v109_v44 }
  0xdf   :  { %330 = vmatmul.mubr.msk.f32.vlgmr.msra.gmra.mrb[0].mxu0 %vm116_vm3, %v115_v46 }
 0x1b2   :  { %v188_v51 = vpop.f32.mrb[0].mxu0 }
 0x1b3   :  { %v189_v52 = vadd.f32 %v304_v50, %v188_v51  ;;  %v331_v53 = vpop.f32.mrb[1].mxu0 }
 0x1b5   :  { %v192_v54 = vmax.f32 %v189_v52, 0.0 }
 0x1b7   :  { %365 = vmatmul.mubr.f32.vlgmr.msra.gmra.mrb[0].mxu1 %v192_v54 }
 0x28a   :  { %v282_v56 = vpop.f32.mrb[0].mxu1 }
 0x28b   :  { %v283_v57 = vadd.f32 %v307_v55, %v282_v56  ;;  %v366_v58 = vpop.f32.mrb[1].mxu1 }
 0x28d   :  { %v286_v59 = vmax.f32 %v283_v57, 0.0 }
 0x28f   :  { %287 = vst [vmem:[#allocation9] sm:$0x3] %v286_v59 }
 0x290   :  { %477 = shalt.err (!%p474_p0)
}
 0x291   :  { %s478_s11 = scalar_lea.hbm %s599_s5, 32 }
 0x292   :  { %p479_p1 = scmp.ne.s32.totalorder %s599_s5, %s478_s11  ;;  %p482_p2 = scmp.lt.u32.totalorder %s478_s11, %s599_s5 }
 0x294   :  { %p484_p3 = pnand %p482_p2, %p479_p1 }
 0x296   :  { %487 = shalt.err (!%p484_p3)
}
 0x297   :  { %297 = dma.vmem_to_hbm [thread:$0]  %s295_s8, 32, %s599_s5, [#allocation5]  }
 0x298   :  { %492 = dma.done.wait [#allocation5], 32  }
 0x299   :  { %493 = vsyncadd [#allocation5], 4294967264 }
 0x29a   :  { %301 = vsyncpa [#allocation4], 1 }
 0x29b   :  { %302 = vsyncpa [#allocation7], 1 }
 0x29c   :  { %303 = vsyncpa [#allocation5], 1 }

// kernel: tpu_custom_call.1
= control target key start
LH: loop header
LB: loop body
LE: loop exit
PB: predicated region body
PF: predicated region fallthrough
CT: control target
= control target key end

     0   :  { %10 = vsyncpa [#allocation4], 0  ;;  %s594_s0 = inlined_call_operand.hbm [shape: f32[2,4,256], index: 0, kind: input, shape index: {}]   ;;  %s595_s1 = inlined_call_operand.hbm [shape: f32[4,128], index: 1, kind: input, shape index: {}]   ;;  %s596_s2 = inlined_call_operand.vmem [shape: f32[1,128], index: 2, kind: input, shape index: {}]   ;;  %s597_s3 = inlined_call_operand.hbm [shape: f32[128,128], index: 3, kind: input, shape index: {}]   ;;  %s598_s4 = inlined_call_operand.vmem [shape: f32[1,128], index: 4, kind: input, shape index: {}]   ;;  %s599_s5 = inlined_call_operand.hbm [shape: f32[2,128], index: 5, kind: output, shape index: {}]  }
   0x1   :  { %11 = vsyncpa [#allocation7], 0 }
   0x2   :  { %12 = vsyncpa [#allocation5], 0  ;;  %s494_s18 = smov [#allocation6]   ;;  %s495_s20 = smov [#allocation3]  }
   0x3   :  { %s31_s19 = sshll.u32 %s494_s18, 4  ;;  %s18_s21 = sshll.u32 %s495_s20, 4  ;;  %s32_s19 = int_to_ptr.vmem [resolvable:$true] %s31_s19  ;;  %s533_s21 = int_to_ptr.vmem [resolvable:$true] %s18_s21 }
   0x4   :  { %s400_s24 = scalar_lea.hbm %s595_s1, 64 }
   0x5   :  { %p401_p0 = scmp.ne.s32.totalorder %s595_s1, %s400_s24  ;;  %p404_p1 = scmp.lt.u32.totalorder %s400_s24, %s595_s1 }
   0x7   :  { %p406_p2 = pnand %p404_p1, %p401_p0 }
   0x9   :  { %409 = shalt.err (!%p406_p2)
}
   0xa   :  { %s410_s29 = scalar_lea.vmem %s32_s19, 64  ;;  %p415_p4 = scmp.lt.s32.totalorder %s32_s19, %s32_s19 }
   0xb   :  { %p411_p3 = scmp.ne.s32.totalorder %s32_s19, %s410_s29  ;;  %p416_p5 = scmp.lt.s32.totalorder %s410_s29, %s410_s29 }
   0xd   :  { %p417_p6 = por %p416_p5, %p415_p4 }
   0xf   :  { %p418_p7 = pnand %p417_p6, %p411_p3 }
  0x11   :  { %421 = shalt.err (!%p418_p7)
}
  0x12   :  { %34 = dma.hbm_to_vmem [thread:$0]  %s595_s1, 64, %s32_s19, [#allocation7]  }
  0x13   :  { %s422_s9 = scalar_lea.hbm %s594_s0, 256 }
  0x14   :  { %p423_p8 = scmp.ne.s32.totalorder %s594_s0, %s422_s9  ;;  %p426_p9 = scmp.lt.u32.totalorder %s422_s9, %s594_s0 }
  0x16   :  { %p428_p10 = pnand %p426_p9, %p423_p8 }
  0x18   :  { %431 = shalt.err (!%p428_p10)
}
  0x19   :  { %s432_s14 = scalar_lea.vmem %s533_s21, 256  ;;  %p437_p12 = scmp.lt.s32.totalorder %s533_s21, %s533_s21 }
  0x1a   :  { %p433_p11 = scmp.ne.s32.totalorder %s533_s21, %s432_s14  ;;  %p438_p13 = scmp.lt.s32.totalorder %s432_s14, %s432_s14 }
  0x1c   :  { %p439_p0 = por %p438_p13, %p437_p12 }
  0x1e   :  { %p440_p1 = pnand %p439_p0, %p433_p11 }
  0x20   :  { %443 = shalt.err (!%p440_p1)
}
  0x21   :  { %s496_s1 = smov 128   ;;  %s497_s15 = smov 8  }
  0x22   :  { %24 = dma.hbm_to_vmem [thread:$0]  %s594_s0, 256, %s533_s21, [#allocation4], %s496_s1, %s496_s1, %s497_s15  }
  0x23   :  { %s498_s18 = smov [#allocation8]   ;;  %s444_s23 = scalar_lea.hbm %s597_s3, 2048 }
  0x24   :  { %s42_s19 = sshll.u32 %s498_s18, 4  ;;  %p445_p2 = scmp.ne.s32.totalorder %s597_s3, %s444_s23  ;;  %s43_s19 = int_to_ptr.vmem [resolvable:$true] %s42_s19 }
  0x25   :  { %p448_p3 = scmp.lt.u32.totalorder %s444_s23, %s597_s3 }
  0x27   :  { %p450_p4 = pnand %p448_p3, %p445_p2 }
  0x29   :  { %453 = shalt.err (!%p450_p4)
}
  0x2a   :  { %s454_s28 = scalar_lea.vmem %s43_s19, 2048  ;;  %p459_p6 = scmp.lt.s32.totalorder %s43_s19, %s43_s19 }
  0x2b   :  { %p455_p5 = scmp.ne.s32.totalorder %s43_s19, %s454_s28  ;;  %p460_p7 = scmp.lt.s32.totalorder %s454_s28, %s454_s28 }
  0x2d   :  { %p461_p8 = por %p460_p7, %p459_p6 }
  0x2f   :  { %p462_p9 = pnand %p461_p8, %p455_p5 }
  0x31   :  { %465 = shalt.err (!%p462_p9)
}
  0x32   :  { %48 = dma.hbm_to_vmem [thread:$0]  %s597_s3, 2048, %s43_s19, [#allocation7], %s496_s1, %s496_s1, %s497_s15  }
  0x33   :  { %488 = dma.done.wait [#allocation4], 256  }
  0x34   :  { %489 = vsyncadd [#allocation4], 4294967040 }
  0x35   :  { %490 = dma.done.wait [#allocation7], 2112  }
  0x36   :  { %491 = vsyncadd [#allocation7], 4294965184  ;;  %v499_v0 = vmov 0.0   ;;  %v66_v1 = vld [vmem:[#allocation3] sm:$0xff]  ;;  %v67_v2 = vld [vmem:[#allocation3 + $0x8] sm:$0xff]  ;;  %vm87_vm0 = vcmask 1043456   ;;  %v104_v38 = vlaneseq }
  0x37   :  { %64 = vst [vmem:[#allocation2] sm:$0xf] %v499_v0  ;;  %65 = vst [vmem:[#allocation2 + $0x4] sm:$0xf] %v499_v0  ;;  %327 = vmatprep.subr.mxu0 %v499_v0  ;;  %v70_v3 = vrot.slane %v66_v1, 4  ;;  %v71_v4 = vrot.slane %v67_v2, 4 }
  0x38   :  { %v94_v15 = vld [vmem:[#allocation6] sm:$0xf]  ;;  %vm500_vm1 = vmmov 0   ;;  %v193_v16 = vld [vmem:[#allocation8] sm:$0xff]  ;;  %v194_v17 = vld [vmem:[#allocation8 + $0x8] sm:$0xff]  ;;  %v501_v19 = vmov 0.0|0.0  }
  0x39   :  { %v74_v7 = vadd.f32 %v70_v3, %v66_v1  ;;  %v75_v8 = vadd.f32 %v71_v4, %v67_v2  ;;  %328 = vmatpush3.msk.msra.mxu0 %vm87_vm0, %v94_v15  ;;  %329 = vmatprep.mubr.msk.f32.mxu0 %vm500_vm1, %v499_v0  ;;  %v195_v18 = vld [vmem:[#allocation8 + $0x10] sm:$0xff]  ;;  %v368_v20 = vpack.c.bf16 %v194_v17, %v193_v16  ;;  %v196_v21 = vld [vmem:[#allocation8 + $0x18] sm:$0xff]  ;;  %v197_v23 = vld [vmem:[#allocation8 + $0x20] sm:$0xff]  ;;  %v105_v39 = vand.u32 127, %v104_v38  ;;  %s502_s7 = smov [#allocation9]  }
  0x3a   :  { %364 = vmatprep.mubr.msk.f32.mxu1 %vm500_vm1, %v499_v0  ;;  %367 = vmatprep.subr.bf16.mxu1 %v501_v19  ;;  %v371_v22 = vpack.c.bf16 %v196_v21, %v195_v18  ;;  %v198_v24 = vld [vmem:[#allocation8 + $0x28] sm:$0xff]  ;;  %v199_v26 = vld [vmem:[#allocation8 + $0x30] sm:$0xff]  ;;  %v200_v27 = vld [vmem:[#allocation8 + $0x38] sm:$0xff]  ;;  %v107_v40 = vshrl.u32 %v104_v38, 7  ;;  %vm114_vm2 = vcmask 1041409   ;;  %vm116_vm3 = vcmask 31744  }
  0x3b   :  { %369 = vmatpush3.bf16.msra.mxu1 %v368_v20  ;;  %v374_v25 = vpack.c.bf16 %v198_v24, %v197_v23  ;;  %v377_v28 = vpack.c.bf16 %v200_v27, %v199_v26  ;;  %v201_v29 = vld [vmem:[#allocation8 + $0x40] sm:$0xff]  ;;  %v202_v30 = vld [vmem:[#allocation8 + $0x48] sm:$0xff]  ;;  %v203_v32 = vld [vmem:[#allocation8 + $0x50] sm:$0xff]  ;;  %s294_s8 = sshll.u32 %s502_s7, 4  ;;  %s295_s8 = int_to_ptr.vmem [resolvable:$true] %s294_s8 }
  0x3c   :  { %370 = vmatprep.subr.bf16.mxu1 %v501_v19  ;;  %v380_v31 = vpack.c.bf16 %v202_v30, %v201_v29  ;;  %v204_v33 = vld [vmem:[#allocation8 + $0x58] sm:$0xff]  ;;  %v205_v35 = vld [vmem:[#allocation8 + $0x60] sm:$0xff]  ;;  %v206_v36 = vld [vmem:[#allocation8 + $0x68] sm:$0xff]  ;;  %v108_v42 = vsub.s32 %v105_v39, %v107_v40  ;;  %s466_s9 = scalar_lea.vmem %s295_s8, 32  ;;  %p471_p11 = scmp.lt.s32.totalorder %s295_s8, %s295_s8 }
  0x3d   :  { %v383_v34 = vpack.c.bf16 %v204_v33, %v203_v32  ;;  %v386_v37 = vpack.c.bf16 %v206_v36, %v205_v35  ;;  %v207_v47 = vld [vmem:[#allocation8 + $0x70] sm:$0xff]  ;;  %v208_v48 = vld [vmem:[#allocation8 + $0x78] sm:$0xff]  ;;  %v304_v50 = vld [vmem:[%s596_s2] ss:$0 sm:$0xff]  ;;  %p467_p10 = scmp.ne.s32.totalorder %s295_s8, %s466_s9  ;;  %p472_p12 = scmp.lt.s32.totalorder %s466_s9, %s466_s9 }
  0x3e   :  { %v76_v5 = vld [vmem:[#allocation2] sm:$0xf]  ;;  %v77_v6 = vld [vmem:[#allocation2 + $0x4] sm:$0xf]  ;;  %v389_v49 = vpack.c.bf16 %v208_v48, %v207_v47 }
  0x3f   :  { %v78_v9 = vadd.f32 %v76_v5, %v74_v7  ;;  %v79_v10 = vadd.f32 %v77_v6, %v75_v8  ;;  %372 = vmatpush3.bf16.msra.mxu1 %v371_v22  ;;  %v307_v55 = vld [vmem:[%s598_s4] ss:$0 sm:$0xff]  ;;  %p473_p13 = por %p472_p12, %p471_p11 }
  0x40   :  { %373 = vmatprep.subr.bf16.mxu1 %v501_v19 }
  0x41   :  { %80 = vst [vmem:[#allocation2] sm:$0xf] %v78_v9  ;;  %81 = vst [vmem:[#allocation2 + $0x4] sm:$0xf] %v79_v10  ;;  %p474_p0 = pnand %p473_p13, %p467_p10 }
  0x43   :  { %375 = vmatpush3.bf16.msra.mxu1 %v374_v25 }
  0x44   :  { %376 = vmatprep.subr.bf16.mxu1 %v501_v19 }
  0x47   :  { %378 = vmatpush3.bf16.msra.mxu1 %v377_v28 }
  0x48   :  { %v85_v11 = vld [vmem:[#allocation2] sm:$0xf]  ;;  %v86_v12 = vld [vmem:[#allocation2 + $0x4] sm:$0xf]  ;;  %379 = vmatprep.subr.bf16.mxu1 %v501_v19 }
  0x49   :  { %v88_v13 = vsel %vm87_vm0, %v85_v11, 0.0  ;;  %v91_v14 = vsel %vm87_vm0, %v86_v12, 0.0 }
  0x4a   :  { %89 = vadd.xlane.f32.xlu0 %v88_v13 }
  0x4b   :  { %381 = vmatpush3.bf16.msra.mxu1 %v380_v31 }
  0x4c   :  { %382 = vmatprep.subr.bf16.mxu1 %v501_v19 }
  0x4e   :  { %92 = vadd.xlane.f32.xlu0 %v91_v14 }
  0x4f   :  { %384 = vmatpush3.bf16.msra.mxu1 %v383_v34 }
  0x50   :  { %385 = vmatprep.subr.bf16.mxu1 %v501_v19 }
  0x53   :  { %387 = vmatpush3.bf16.msra.mxu1 %v386_v37 }
  0x54   :  { %388 = vmatprep.subr.bf16.mxu1 %v501_v19 }
  0x57   :  { %390 = vmatpush3.bf16.msra.mxu1 %v389_v49 }
  0xd7   :  { %v90_v41 = vpop.xlane.xlu0 %89 }
  0xd8   :  { %v109_v44 = vrot.slane %v90_v41, %v108_v42 }
  0xdb   :  { %v93_v43 = vpop.xlane.xlu0 %92 }
  0xdc   :  { %v113_v45 = vrot.slane %v93_v43, %v108_v42 }
  0xde   :  { %v115_v46 = vsel %vm114_vm2, %v113_v45, %v109_v44 }
  0xdf   :  { %330 = vmatmul.mubr.msk.f32.vlgmr.msra.gmra.mrb[0].mxu0 %vm116_vm3, %v115_v46 }
 0x1b2   :  { %v188_v51 = vpop.f32.mrb[0].mxu0 }
 0x1b3   :  { %v189_v52 = vadd.f32 %v304_v50, %v188_v51  ;;  %v331_v53 = vpop.f32.mrb[1].mxu0 }
 0x1b5   :  { %v192_v54 = vmax.f32 %v189_v52, 0.0 }
 0x1b7   :  { %365 = vmatmul.mubr.f32.vlgmr.msra.gmra.mrb[0].mxu1 %v192_v54 }
 0x28a   :  { %v282_v56 = vpop.f32.mrb[0].mxu1 }
 0x28b   :  { %v283_v57 = vadd.f32 %v307_v55, %v282_v56  ;;  %v366_v58 = vpop.f32.mrb[1].mxu1 }
 0x28d   :  { %v286_v59 = vmax.f32 %v283_v57, 0.0 }
 0x28f   :  { %287 = vst [vmem:[#allocation9] sm:$0x3] %v286_v59 }
 0x290   :  { %477 = shalt.err (!%p474_p0)
}
 0x291   :  { %s478_s11 = scalar_lea.hbm %s599_s5, 32 }
 0x292   :  { %p479_p1 = scmp.ne.s32.totalorder %s599_s5, %s478_s11  ;;  %p482_p2 = scmp.lt.u32.totalorder %s478_s11, %s599_s5 }
 0x294   :  { %p484_p3 = pnand %p482_p2, %p479_p1 }
 0x296   :  { %487 = shalt.err (!%p484_p3)
}
 0x297   :  { %297 = dma.vmem_to_hbm [thread:$0]  %s295_s8, 32, %s599_s5, [#allocation5]  }
 0x298   :  { %492 = dma.done.wait [#allocation5], 32  }
 0x299   :  { %493 = vsyncadd [#allocation5], 4294967264 }
 0x29a   :  { %301 = vsyncpa [#allocation4], 1 }
 0x29b   :  { %302 = vsyncpa [#allocation7], 1 }
 0x29c   :  { %303 = vsyncpa [#allocation5], 1 }

</bundles_post_ra>
